<compile_context>
chip_gen: v7x
topology: tpu7x:2x2x1
jax: 0.10.0
libtpu: 0.0.40
codegen_flags: <defaults>
</compile_context>

<pallas_src>
import functools
import math

import jax
import jax.numpy as jnp
from jax.experimental import pallas as pl
from jax.experimental.pallas import tpu as pltpu


# ----------------------------- kernel helpers -----------------------------

def _layernorm(x, w, b, eps=1e-12):
    # BertLayerNorm: u = mean, s = mean((x-u)^2), (x-u)/sqrt(s+eps)*w + b
    u = jnp.mean(x, axis=-1, keepdims=True)
    s = jnp.mean((x - u) * (x - u), axis=-1, keepdims=True)
    return (x - u) * jax.lax.rsqrt(s + eps) * w + b


def _gelu_exact(x):
    # x * 0.5 * (1 + erf(x / sqrt(2)))  (exact erf gelu, as in the torch code)
    return x * 0.5 * (1.0 + jax.lax.erf(x / math.sqrt(2.0)))


def _softmax_lastdim(s):
    # Numerically stable softmax; divide goes to the EUP via approx reciprocal.
    m = jnp.max(s, axis=-1, keepdims=True)
    p = jnp.exp(s - m)
    denom = jnp.sum(p, axis=-1, keepdims=True)
    return p * pl.reciprocal(denom, approx=True)


# ------------------------------- the kernel -------------------------------

def _two_modal_kernel(tok_ref,
                      wqkv, bqkv,
                      wo, bo, ln1w, ln1b,
                      wi, bi, wout, bout, ln2w, ln2b,
                      out_ref, *, s1):
    f32 = jnp.float32
    bf16 = jnp.bfloat16

    x = tok_ref[0]                       # (S1+S2, H) f32, rows = [modal1 ; modal2]
    hidden = x.shape[-1]

    # Fused Q/K/V projection over ALL tokens of both modalities (M = S1+S2).
    # wqkv already has 1/sqrt(H) folded into the Q columns (wrapper-side).
    qkv = jnp.dot(x.astype(bf16), wqkv[...],
                  preferred_element_type=f32) + bqkv[...]
    q = qkv[:, :hidden]
    k = qkv[:, hidden:2 * hidden]
    v = qkv[:, 2 * hidden:]

    # f32 slices are (8,128)-tile aligned; cast to bf16 at the dot boundary.
    q1 = q[:s1].astype(bf16)   # modal1 queries
    q2 = q[s1:].astype(bf16)   # modal2 queries
    k1 = k[:s1].astype(bf16)   # modal1 keys
    k2 = k[s1:].astype(bf16)   # modal2 keys
    v1 = v[:s1].astype(bf16)   # modal1 values
    v2 = v[s1:].astype(bf16)   # modal2 values

    nt = (((1,), (1,)), ((), ()))        # q @ k^T without materializing k.T

    # Direction A: modal1 queries attend over modal2 keys/values.
    s_a = jax.lax.dot_general(q1, k2, nt, preferred_element_type=f32)
    ctx_a = jnp.dot(_softmax_lastdim(s_a).astype(bf16), v2,
                    preferred_element_type=f32)

    # Direction B: modal2 queries attend over modal1 keys/values.
    s_b = jax.lax.dot_general(q2, k1, nt, preferred_element_type=f32)
    ctx_b = jnp.dot(_softmax_lastdim(s_b).astype(bf16), v1,
                    preferred_element_type=f32)

    ctx = jnp.concatenate([ctx_a, ctx_b], axis=0)      # (S1+S2, H)

    # BertSelfOutput: dense + residual(query tokens) + LayerNorm.
    attn = _layernorm(
        jnp.dot(ctx.astype(bf16), wo[...], preferred_element_type=f32)
        + bo[...] + x,
        ln1w[...], ln1b[...])

    # BertIntermediate: dense + exact-erf GELU (f32 elementwise).
    inter = _gelu_exact(
        jnp.dot(attn.astype(bf16), wi[...], preferred_element_type=f32)
        + bi[...])

    # BertOutput: dense + residual(attn) + LayerNorm.
    out = _layernorm(
        jnp.dot(inter.astype(bf16), wout[...], preferred_element_type=f32)
        + bout[...] + attn,
        ln2w[...], ln2b[...])

    out_ref[0] = out.astype(out_ref.dtype)


# ------------------------------- the wrapper -------------------------------

def two_modal_layer(modal1, modal2, params, *, matmul_dtype=jnp.bfloat16):
    """TwoModalLayer forward.  modal1: (B,S1,H), modal2: (B,S2,H) float32."""
    B, S1, H = modal1.shape
    _, S2, _ = modal2.shape
    S = S1 + S2
    f32 = jnp.float32

    # One-time parameter transforms (plain XLA, outside the kernel):
    #   fold 1/sqrt(H) into the query projection, fuse wq|wk|wv, cast matmul
    #   weights to bf16 (halves weight HBM traffic).  Biases / LN params stay
    #   f32 (added on the VPU to f32 accumulators).
    scale = 1.0 / math.sqrt(H)
    wqkv = jnp.concatenate(
        [params['wq'] * scale, params['wk'], params['wv']],
        axis=1).astype(matmul_dtype)
    bqkv = jnp.concatenate(
        [params['bq'] * scale, params['bk'], params['bv']],
        axis=-1).astype(f32)
    wo = params['wo'].astype(matmul_dtype)
    wi = params['wi'].astype(matmul_dtype)
    wout = params['wout'].astype(matmul_dtype)

    consts = [wqkv, bqkv,
              wo, params['bo'], params['ln1w'], params['ln1b'],
              wi, params['bi'], wout, params['bout'],
              params['ln2w'], params['ln2b']]

    # Both modalities concatenated along the sequence axis: each grid step
    # (one batch element) runs every token-wise matmul with M = S1+S2 rows and
    # computes BOTH cross-attention directions.
    tokens = jnp.concatenate([modal1, modal2], axis=1).astype(f32)  # (B, S, H)

    def const_spec(arr):
        nd = arr.ndim
        # Constant block index across the grid -> the weight is DMA'd into VMEM
        # once and stays resident for all batch steps.  At BERT-scale H/I one
        # would additionally single-buffer these (pipeline_mode=pl.Buffered(1))
        # to halve the VMEM footprint on v7x; at these sizes (<2 MiB total)
        # the default double-buffering is harmless.
        return pl.BlockSpec(arr.shape, lambda b, _nd=nd: (0,) * _nd)

    out = pl.pallas_call(
        functools.partial(_two_modal_kernel, s1=S1),
        out_shape=jax.ShapeDtypeStruct((B, S, H), f32),
        grid_spec=pltpu.PrefetchScalarGridSpec(
            num_scalar_prefetch=0,
            grid=(B,),
            in_specs=[pl.BlockSpec((1, S, H), lambda b: (b, 0, 0))]
                     + [const_spec(c) for c in consts],
            out_specs=pl.BlockSpec((1, S, H), lambda b: (b, 0, 0)),
        ),
        compiler_params=pltpu.CompilerParams(
            dimension_semantics=("parallel",),
            vmem_limit_bytes=32 * 1024 * 1024),
    )(tokens, *consts)

    # Rows [0:S1] are modal1_out, rows [S1:] are modal2_out.
    return out[:, :S1, :], out[:, S1:, :]


# ------------------------- deterministic param init -------------------------

def init_cross_layer_params(key, H, I):
    ks = jax.random.split(key, 10)
    s = 0.02
    return {
        'wq': jax.random.normal(ks[0], (H, H), jnp.float32) * s,
        'bq': jax.random.normal(ks[1], (1, H), jnp.float32) * s,
        'wk': jax.random.normal(ks[2], (H, H), jnp.float32) * s,
        'bk': jax.random.normal(ks[3], (1, H), jnp.float32) * s,
        'wv': jax.random.normal(ks[4], (H, H), jnp.float32) * s,
        'bv': jax.random.normal(ks[5], (1, H), jnp.float32) * s,
        'wo': jax.random.normal(ks[6], (H, H), jnp.float32) * s,
        'bo': jax.random.normal(ks[7], (1, H), jnp.float32) * s,
        'ln1w': jnp.ones((1, H), jnp.float32),
        'ln1b': jnp.zeros((1, H), jnp.float32),
        'wi': jax.random.normal(ks[8], (H, I), jnp.float32) * s,
        'bi': jax.random.normal(ks[9], (1, I), jnp.float32) * s,
        'wout': jax.random.normal(ks[0], (I, H), jnp.float32) * s,
        'bout': jax.random.normal(ks[1], (1, H), jnp.float32) * s,
        'ln2w': jnp.ones((1, H), jnp.float32),
        'ln2b': jnp.zeros((1, H), jnp.float32),
    }


# ------------------------------ pure-JAX ref ------------------------------

def ref_cross_layer(query, key, p):
    H = query.shape[-1]
    q = query @ p['wq'] + p['bq']
    k = key @ p['wk'] + p['bk']
    v = key @ p['wv'] + p['bv']
    scores = jnp.einsum('bqh,bkh->bqk', q, k) / math.sqrt(H) + 1.0
    probs = jax.nn.softmax(scores, axis=-1)
    ctx = jnp.einsum('bqk,bkh->bqh', probs, v)

    def ln(x, w, b, eps=1e-12):
        u = jnp.mean(x, -1, keepdims=True)
        s = jnp.mean((x - u) ** 2, -1, keepdims=True)
        return (x - u) / jnp.sqrt(s + eps) * w + b

    attn = ln(ctx @ p['wo'] + p['bo'] + query, p['ln1w'], p['ln1b'])
    inter = attn @ p['wi'] + p['bi']
    inter = inter * 0.5 * (1.0 + jax.lax.erf(inter / math.sqrt(2.0)))
    return ln(inter @ p['wout'] + p['bout'] + attn, p['ln2w'], p['ln2b'])


def ref_two_modal(modal1, modal2, p):
    # Matches the PyTorch forward: both outputs use cross1's weights.
    return ref_cross_layer(modal1, modal2, p), ref_cross_layer(modal2, modal1, p)


# ----------------------------------- main -----------------------------------

if __name__ == "__main__":
    B, S1, S2 = 2, 8, 16
    H, I = 128, 512

    root = jax.random.PRNGKey(0)
    k_m1, k_m2, k_p = jax.random.split(root, 3)
    modal1 = jax.random.normal(k_m1, (B, S1, H), jnp.float32)
    modal2 = jax.random.normal(k_m2, (B, S2, H), jnp.float32)
    params = init_cross_layer_params(k_p, H, I)

    fwd = jax.jit(two_modal_layer)
    out1, out2 = fwd(modal1, modal2, params)
    out1, out2 = jax.block_until_ready((out1, out2))

    r1, r2 = ref_two_modal(modal1, modal2, params)
    assert out1.shape == (B, S1, H) and out2.shape == (B, S2, H)
    # Tolerance relaxed vs. the pure-f32 version because the kernel uses bf16
    # MXU operands (f32 accumulate) and an approx-reciprocal softmax divide.
    assert jnp.allclose(out1, r1, atol=2e-2, rtol=2e-2)
    assert jnp.allclose(out2, r2, atol=2e-2, rtol=2e-2)

    print("KERNEL_OK")
</pallas_src>

<mosaic_0001>
module attributes {stable_mosaic.version = 11 : i64} {
  func.func @_two_modal_kernel(%arg0: i32, %arg1: memref<1x24x128xf32, #tpu.memory_space<vmem>>, %arg2: memref<128x384xbf16, #tpu.memory_space<vmem>>, %arg3: memref<1x384xf32, #tpu.memory_space<vmem>>, %arg4: memref<128x128xbf16, #tpu.memory_space<vmem>>, %arg5: memref<1x128xf32, #tpu.memory_space<vmem>>, %arg6: memref<1x128xf32, #tpu.memory_space<vmem>>, %arg7: memref<1x128xf32, #tpu.memory_space<vmem>>, %arg8: memref<128x512xbf16, #tpu.memory_space<vmem>>, %arg9: memref<1x512xf32, #tpu.memory_space<vmem>>, %arg10: memref<512x128xbf16, #tpu.memory_space<vmem>>, %arg11: memref<1x128xf32, #tpu.memory_space<vmem>>, %arg12: memref<1x128xf32, #tpu.memory_space<vmem>>, %arg13: memref<1x128xf32, #tpu.memory_space<vmem>>, %arg14: memref<1x24x128xf32, #tpu.memory_space<vmem>>) attributes {dimension_semantics = [#tpu.dimension_semantics<parallel>], iteration_bounds = array<i64: 2>, scalar_prefetch = 0 : i64, scratch_operands = 0 : i64, tpu.core_type = #tpu.core_type<tc>, window_params = [{transform_indices = @transform_0, window_bounds = array<i64: 1, 24, 128>}, {pipeline_mode = #tpu.pipeline_mode<synchronous>, transform_indices = @transform_1, window_bounds = array<i64: 128, 384>}, {pipeline_mode = #tpu.pipeline_mode<synchronous>, transform_indices = @transform_2, window_bounds = array<i64: 1, 384>}, {pipeline_mode = #tpu.pipeline_mode<synchronous>, transform_indices = @transform_3, window_bounds = array<i64: 128, 128>}, {pipeline_mode = #tpu.pipeline_mode<synchronous>, transform_indices = @transform_4, window_bounds = array<i64: 1, 128>}, {pipeline_mode = #tpu.pipeline_mode<synchronous>, transform_indices = @transform_5, window_bounds = array<i64: 1, 128>}, {pipeline_mode = #tpu.pipeline_mode<synchronous>, transform_indices = @transform_6, window_bounds = array<i64: 1, 128>}, {pipeline_mode = #tpu.pipeline_mode<synchronous>, transform_indices = @transform_7, window_bounds = array<i64: 128, 512>}, {pipeline_mode = #tpu.pipeline_mode<synchronous>, transform_indices = @transform_8, window_bounds = array<i64: 1, 512>}, {pipeline_mode = #tpu.pipeline_mode<synchronous>, transform_indices = @transform_9, window_bounds = array<i64: 512, 128>}, {pipeline_mode = #tpu.pipeline_mode<synchronous>, transform_indices = @transform_10, window_bounds = array<i64: 1, 128>}, {pipeline_mode = #tpu.pipeline_mode<synchronous>, transform_indices = @transform_11, window_bounds = array<i64: 1, 128>}, {pipeline_mode = #tpu.pipeline_mode<synchronous>, transform_indices = @transform_12, window_bounds = array<i64: 1, 128>}, {transform_indices = @transform_13, window_bounds = array<i64: 1, 24, 128>}]} {
    %c0 = arith.constant 0 : index
    %c0_0 = arith.constant 0 : index
    %c0_1 = arith.constant 0 : index
    %0 = vector.load %arg1[%c0, %c0_0, %c0_1] : memref<1x24x128xf32, #tpu.memory_space<vmem>>, vector<1x24x128xf32>
    %1 = vector.shape_cast %0 : vector<1x24x128xf32> to vector<24x128xf32>
    %2 = arith.truncf %1 : vector<24x128xf32> to vector<24x128xbf16>
    %c0_2 = arith.constant 0 : index
    %c0_3 = arith.constant 0 : index
    %3 = vector.load %arg2[%c0_2, %c0_3] : memref<128x384xbf16, #tpu.memory_space<vmem>>, vector<128x384xbf16>
    %cst = arith.constant dense<0.000000e+00> : vector<24x384xf32>
    %4 = tpu.matmul %2, %3, %cst {dimension_numbers = #tpu.dot_dimension_numbers<[1], [0], [0], [1], [0, 0, 1, 1], [], []>} : vector<24x128xbf16>, vector<128x384xbf16>, vector<24x384xf32> -> vector<24x384xf32>
    %c0_4 = arith.constant 0 : index
    %c0_5 = arith.constant 0 : index
    %5 = vector.load %arg3[%c0_4, %c0_5] : memref<1x384xf32, #tpu.memory_space<vmem>>, vector<1x384xf32>
    %6 = vector.broadcast %5 : vector<1x384xf32> to vector<24x384xf32>
    %7 = arith.addf %4, %6 : vector<24x384xf32>
    %8 = vector.extract_strided_slice %7 {offsets = [0, 0], sizes = [24, 128], strides = [1, 1]} : vector<24x384xf32> to vector<24x128xf32>
    %9 = vector.extract_strided_slice %7 {offsets = [0, 128], sizes = [24, 128], strides = [1, 1]} : vector<24x384xf32> to vector<24x128xf32>
    %10 = vector.extract_strided_slice %7 {offsets = [0, 256], sizes = [24, 128], strides = [1, 1]} : vector<24x384xf32> to vector<24x128xf32>
    %11 = vector.extract_strided_slice %8 {offsets = [0, 0], sizes = [8, 128], strides = [1, 1]} : vector<24x128xf32> to vector<8x128xf32>
    %12 = arith.truncf %11 : vector<8x128xf32> to vector<8x128xbf16>
    %13 = vector.extract_strided_slice %8 {offsets = [8, 0], sizes = [16, 128], strides = [1, 1]} : vector<24x128xf32> to vector<16x128xf32>
    %14 = arith.truncf %13 : vector<16x128xf32> to vector<16x128xbf16>
    %15 = vector.extract_strided_slice %9 {offsets = [0, 0], sizes = [8, 128], strides = [1, 1]} : vector<24x128xf32> to vector<8x128xf32>
    %16 = arith.truncf %15 : vector<8x128xf32> to vector<8x128xbf16>
    %17 = vector.extract_strided_slice %9 {offsets = [8, 0], sizes = [16, 128], strides = [1, 1]} : vector<24x128xf32> to vector<16x128xf32>
    %18 = arith.truncf %17 : vector<16x128xf32> to vector<16x128xbf16>
    %19 = vector.extract_strided_slice %10 {offsets = [0, 0], sizes = [8, 128], strides = [1, 1]} : vector<24x128xf32> to vector<8x128xf32>
    %20 = arith.truncf %19 : vector<8x128xf32> to vector<8x128xbf16>
    %21 = vector.extract_strided_slice %10 {offsets = [8, 0], sizes = [16, 128], strides = [1, 1]} : vector<24x128xf32> to vector<16x128xf32>
    %22 = arith.truncf %21 : vector<16x128xf32> to vector<16x128xbf16>
    %cst_6 = arith.constant dense<0.000000e+00> : vector<8x16xf32>
    %23 = tpu.matmul %12, %18, %cst_6 {dimension_numbers = #tpu.dot_dimension_numbers<[1], [1], [0], [0], [0, 0, 1, 0], [], []>} : vector<8x128xbf16>, vector<16x128xbf16>, vector<8x16xf32> -> vector<8x16xf32>
    %cst_7 = arith.constant dense<0xFF800000> : vector<8xf32>
    %24 = vector.multi_reduction <maximumf>, %23, %cst_7 [1] : vector<8x16xf32> to vector<8xf32>
    %25 = vector.shape_cast %24 : vector<8xf32> to vector<8x1xf32>
    %26 = vector.broadcast %25 : vector<8x1xf32> to vector<8x16xf32>
    %27 = arith.subf %23, %26 : vector<8x16xf32>
    %28 = math.exp %27 : vector<8x16xf32>
    %cst_8 = arith.constant dense<0.000000e+00> : vector<8xf32>
    %29 = vector.multi_reduction <add>, %28, %cst_8 [1] : vector<8x16xf32> to vector<8xf32>
    %30 = vector.shape_cast %29 : vector<8xf32> to vector<8x1xf32>
    %31 = tpu.reciprocal %30 {approx = true} : vector<8x1xf32> -> vector<8x1xf32>
    %32 = vector.broadcast %31 : vector<8x1xf32> to vector<8x16xf32>
    %33 = arith.mulf %28, %32 : vector<8x16xf32>
    %34 = arith.truncf %33 : vector<8x16xf32> to vector<8x16xbf16>
    %cst_9 = arith.constant dense<0.000000e+00> : vector<8x128xf32>
    %35 = tpu.matmul %34, %22, %cst_9 {dimension_numbers = #tpu.dot_dimension_numbers<[1], [0], [0], [1], [0, 0, 1, 1], [], []>} : vector<8x16xbf16>, vector<16x128xbf16>, vector<8x128xf32> -> vector<8x128xf32>
    %cst_10 = arith.constant dense<0.000000e+00> : vector<16x8xf32>
    %36 = tpu.matmul %14, %16, %cst_10 {dimension_numbers = #tpu.dot_dimension_numbers<[1], [1], [0], [0], [0, 0, 1, 0], [], []>} : vector<16x128xbf16>, vector<8x128xbf16>, vector<16x8xf32> -> vector<16x8xf32>
    %cst_11 = arith.constant dense<0xFF800000> : vector<16xf32>
    %37 = vector.multi_reduction <maximumf>, %36, %cst_11 [1] : vector<16x8xf32> to vector<16xf32>
    %38 = vector.shape_cast %37 : vector<16xf32> to vector<16x1xf32>
    %39 = vector.broadcast %38 : vector<16x1xf32> to vector<16x8xf32>
    %40 = arith.subf %36, %39 : vector<16x8xf32>
    %41 = math.exp %40 : vector<16x8xf32>
    %cst_12 = arith.constant dense<0.000000e+00> : vector<16xf32>
    %42 = vector.multi_reduction <add>, %41, %cst_12 [1] : vector<16x8xf32> to vector<16xf32>
    %43 = vector.shape_cast %42 : vector<16xf32> to vector<16x1xf32>
    %44 = tpu.reciprocal %43 {approx = true} : vector<16x1xf32> -> vector<16x1xf32>
    %45 = vector.broadcast %44 : vector<16x1xf32> to vector<16x8xf32>
    %46 = arith.mulf %41, %45 : vector<16x8xf32>
    %47 = arith.truncf %46 : vector<16x8xf32> to vector<16x8xbf16>
    %cst_13 = arith.constant dense<0.000000e+00> : vector<16x128xf32>
    %48 = tpu.matmul %47, %20, %cst_13 {dimension_numbers = #tpu.dot_dimension_numbers<[1], [0], [0], [1], [0, 0, 1, 1], [], []>} : vector<16x8xbf16>, vector<8x128xbf16>, vector<16x128xf32> -> vector<16x128xf32>
    %49 = tpu.concatenate %35, %48 in 0 : vector<8x128xf32>, vector<16x128xf32> -> vector<24x128xf32>
    %50 = arith.truncf %49 : vector<24x128xf32> to vector<24x128xbf16>
    %c0_14 = arith.constant 0 : index
    %c0_15 = arith.constant 0 : index
    %51 = vector.load %arg4[%c0_14, %c0_15] : memref<128x128xbf16, #tpu.memory_space<vmem>>, vector<128x128xbf16>
    %cst_16 = arith.constant dense<0.000000e+00> : vector<24x128xf32>
    %52 = tpu.matmul %50, %51, %cst_16 {dimension_numbers = #tpu.dot_dimension_numbers<[1], [0], [0], [1], [0, 0, 1, 1], [], []>} : vector<24x128xbf16>, vector<128x128xbf16>, vector<24x128xf32> -> vector<24x128xf32>
    %c0_17 = arith.constant 0 : index
    %c0_18 = arith.constant 0 : index
    %53 = vector.load %arg5[%c0_17, %c0_18] : memref<1x128xf32, #tpu.memory_space<vmem>>, vector<1x128xf32>
    %54 = vector.broadcast %53 : vector<1x128xf32> to vector<24x128xf32>
    %55 = arith.addf %52, %54 : vector<24x128xf32>
    %56 = arith.addf %55, %1 : vector<24x128xf32>
    %c0_19 = arith.constant 0 : index
    %c0_20 = arith.constant 0 : index
    %57 = vector.load %arg6[%c0_19, %c0_20] : memref<1x128xf32, #tpu.memory_space<vmem>>, vector<1x128xf32>
    %c0_21 = arith.constant 0 : index
    %c0_22 = arith.constant 0 : index
    %58 = vector.load %arg7[%c0_21, %c0_22] : memref<1x128xf32, #tpu.memory_space<vmem>>, vector<1x128xf32>
    %cst_23 = arith.constant dense<0.000000e+00> : vector<24xf32>
    %59 = vector.multi_reduction <add>, %56, %cst_23 [1] : vector<24x128xf32> to vector<24xf32>
    %60 = vector.shape_cast %59 : vector<24xf32> to vector<24x1xf32>
    %cst_24 = arith.constant 1.280000e+02 : f32
    %61 = vector.broadcast %cst_24 : f32 to vector<24x1xf32>
    %62 = arith.divf %60, %61 : vector<24x1xf32>
    %63 = vector.broadcast %62 : vector<24x1xf32> to vector<24x128xf32>
    %64 = arith.subf %56, %63 : vector<24x128xf32>
    %65 = vector.broadcast %62 : vector<24x1xf32> to vector<24x128xf32>
    %66 = arith.subf %56, %65 : vector<24x128xf32>
    %67 = arith.mulf %64, %66 : vector<24x128xf32>
    %cst_25 = arith.constant dense<0.000000e+00> : vector<24xf32>
    %68 = vector.multi_reduction <add>, %67, %cst_25 [1] : vector<24x128xf32> to vector<24xf32>
    %69 = vector.shape_cast %68 : vector<24xf32> to vector<24x1xf32>
    %cst_26 = arith.constant 1.280000e+02 : f32
    %70 = vector.broadcast %cst_26 : f32 to vector<24x1xf32>
    %71 = arith.divf %69, %70 : vector<24x1xf32>
    %72 = vector.broadcast %62 : vector<24x1xf32> to vector<24x128xf32>
    %73 = arith.subf %56, %72 : vector<24x128xf32>
    %cst_27 = arith.constant 9.99999996E-13 : f32
    %74 = vector.broadcast %cst_27 : f32 to vector<24x1xf32>
    %75 = arith.addf %71, %74 : vector<24x1xf32>
    %76 = math.rsqrt %75 : vector<24x1xf32>
    %77 = vector.broadcast %76 : vector<24x1xf32> to vector<24x128xf32>
    %78 = arith.mulf %73, %77 : vector<24x128xf32>
    %79 = vector.broadcast %57 : vector<1x128xf32> to vector<24x128xf32>
    %80 = arith.mulf %78, %79 : vector<24x128xf32>
    %81 = vector.broadcast %58 : vector<1x128xf32> to vector<24x128xf32>
    %82 = arith.addf %80, %81 : vector<24x128xf32>
    %83 = arith.truncf %82 : vector<24x128xf32> to vector<24x128xbf16>
    %c0_28 = arith.constant 0 : index
    %c0_29 = arith.constant 0 : index
    %84 = vector.load %arg8[%c0_28, %c0_29] : memref<128x512xbf16, #tpu.memory_space<vmem>>, vector<128x512xbf16>
    %cst_30 = arith.constant dense<0.000000e+00> : vector<24x512xf32>
    %85 = tpu.matmul %83, %84, %cst_30 {dimension_numbers = #tpu.dot_dimension_numbers<[1], [0], [0], [1], [0, 0, 1, 1], [], []>} : vector<24x128xbf16>, vector<128x512xbf16>, vector<24x512xf32> -> vector<24x512xf32>
    %c0_31 = arith.constant 0 : index
    %c0_32 = arith.constant 0 : index
    %86 = vector.load %arg9[%c0_31, %c0_32] : memref<1x512xf32, #tpu.memory_space<vmem>>, vector<1x512xf32>
    %87 = vector.broadcast %86 : vector<1x512xf32> to vector<24x512xf32>
    %88 = arith.addf %85, %87 : vector<24x512xf32>
    %cst_33 = arith.constant 5.000000e-01 : f32
    %89 = vector.broadcast %cst_33 : f32 to vector<24x512xf32>
    %90 = arith.mulf %88, %89 : vector<24x512xf32>
    %cst_34 = arith.constant 1.41421354 : f32
    %91 = vector.broadcast %cst_34 : f32 to vector<24x512xf32>
    %92 = arith.divf %88, %91 : vector<24x512xf32>
    %93 = math.erf %92 : vector<24x512xf32>
    %cst_35 = arith.constant 1.000000e+00 : f32
    %94 = vector.broadcast %cst_35 : f32 to vector<24x512xf32>
    %95 = arith.addf %94, %93 : vector<24x512xf32>
    %96 = arith.mulf %90, %95 : vector<24x512xf32>
    %97 = arith.truncf %96 : vector<24x512xf32> to vector<24x512xbf16>
    %c0_36 = arith.constant 0 : index
    %c0_37 = arith.constant 0 : index
    %98 = vector.load %arg10[%c0_36, %c0_37] : memref<512x128xbf16, #tpu.memory_space<vmem>>, vector<512x128xbf16>
    %cst_38 = arith.constant dense<0.000000e+00> : vector<24x128xf32>
    %99 = tpu.matmul %97, %98, %cst_38 {dimension_numbers = #tpu.dot_dimension_numbers<[1], [0], [0], [1], [0, 0, 1, 1], [], []>} : vector<24x512xbf16>, vector<512x128xbf16>, vector<24x128xf32> -> vector<24x128xf32>
    %c0_39 = arith.constant 0 : index
    %c0_40 = arith.constant 0 : index
    %100 = vector.load %arg11[%c0_39, %c0_40] : memref<1x128xf32, #tpu.memory_space<vmem>>, vector<1x128xf32>
    %101 = vector.broadcast %100 : vector<1x128xf32> to vector<24x128xf32>
    %102 = arith.addf %99, %101 : vector<24x128xf32>
    %103 = arith.addf %102, %82 : vector<24x128xf32>
    %c0_41 = arith.constant 0 : index
    %c0_42 = arith.constant 0 : index
    %104 = vector.load %arg12[%c0_41, %c0_42] : memref<1x128xf32, #tpu.memory_space<vmem>>, vector<1x128xf32>
    %c0_43 = arith.constant 0 : index
    %c0_44 = arith.constant 0 : index
    %105 = vector.load %arg13[%c0_43, %c0_44] : memref<1x128xf32, #tpu.memory_space<vmem>>, vector<1x128xf32>
    %cst_45 = arith.constant dense<0.000000e+00> : vector<24xf32>
    %106 = vector.multi_reduction <add>, %103, %cst_45 [1] : vector<24x128xf32> to vector<24xf32>
    %107 = vector.shape_cast %106 : vector<24xf32> to vector<24x1xf32>
    %cst_46 = arith.constant 1.280000e+02 : f32
    %108 = vector.broadcast %cst_46 : f32 to vector<24x1xf32>
    %109 = arith.divf %107, %108 : vector<24x1xf32>
    %110 = vector.broadcast %109 : vector<24x1xf32> to vector<24x128xf32>
    %111 = arith.subf %103, %110 : vector<24x128xf32>
    %112 = vector.broadcast %109 : vector<24x1xf32> to vector<24x128xf32>
    %113 = arith.subf %103, %112 : vector<24x128xf32>
    %114 = arith.mulf %111, %113 : vector<24x128xf32>
    %cst_47 = arith.constant dense<0.000000e+00> : vector<24xf32>
    %115 = vector.multi_reduction <add>, %114, %cst_47 [1] : vector<24x128xf32> to vector<24xf32>
    %116 = vector.shape_cast %115 : vector<24xf32> to vector<24x1xf32>
    %cst_48 = arith.constant 1.280000e+02 : f32
    %117 = vector.broadcast %cst_48 : f32 to vector<24x1xf32>
    %118 = arith.divf %116, %117 : vector<24x1xf32>
    %119 = vector.broadcast %109 : vector<24x1xf32> to vector<24x128xf32>
    %120 = arith.subf %103, %119 : vector<24x128xf32>
    %cst_49 = arith.constant 9.99999996E-13 : f32
    %121 = vector.broadcast %cst_49 : f32 to vector<24x1xf32>
    %122 = arith.addf %118, %121 : vector<24x1xf32>
    %123 = math.rsqrt %122 : vector<24x1xf32>
    %124 = vector.broadcast %123 : vector<24x1xf32> to vector<24x128xf32>
    %125 = arith.mulf %120, %124 : vector<24x128xf32>
    %126 = vector.broadcast %104 : vector<1x128xf32> to vector<24x128xf32>
    %127 = arith.mulf %125, %126 : vector<24x128xf32>
    %128 = vector.broadcast %105 : vector<1x128xf32> to vector<24x128xf32>
    %129 = arith.addf %127, %128 : vector<24x128xf32>
    %c0_50 = arith.constant 0 : index
    %c0_51 = arith.constant 0 : index
    %c0_52 = arith.constant 0 : index
    %130 = vector.load %arg14[%c0_50, %c0_51, %c0_52] : memref<1x24x128xf32, #tpu.memory_space<vmem>>, vector<1x24x128xf32>
    %131 = vector.shape_cast %130 : vector<1x24x128xf32> to vector<24x128xf32>
    %132 = vector.shape_cast %129 : vector<24x128xf32> to vector<1x24x128xf32>
    tpu.vector_store %arg14[%c0_50, %c0_51, %c0_52], %132 {strides = array<i32>} : memref<1x24x128xf32, #tpu.memory_space<vmem>>, vector<1x24x128xf32>,
    return
  }
  func.func @transform_0(%arg0: i32) -> (i32, i32, i32) {
    %c0_i32 = arith.constant 0 : i32
    %c0_i32_0 = arith.constant 0 : i32
    %c0_i32_1 = arith.constant 0 : i32
    return %arg0, %c0_i32, %c0_i32_0 : i32, i32, i32
  }
  func.func @transform_1(%arg0: i32) -> (i32, i32) {
    %c0_i32 = arith.constant 0 : i32
    %c0_i32_0 = arith.constant 0 : i32
    %c0_i32_1 = arith.constant 0 : i32
    return %c0_i32, %c0_i32_0 : i32, i32
  }
  func.func @transform_2(%arg0: i32) -> (i32, i32) {
    %c0_i32 = arith.constant 0 : i32
    %c0_i32_0 = arith.constant 0 : i32
    %c0_i32_1 = arith.constant 0 : i32
    return %c0_i32, %c0_i32_0 : i32, i32
  }
  func.func @transform_3(%arg0: i32) -> (i32, i32) {
    %c0_i32 = arith.constant 0 : i32
    %c0_i32_0 = arith.constant 0 : i32
    %c0_i32_1 = arith.constant 0 : i32
    return %c0_i32, %c0_i32_0 : i32, i32
  }
  func.func @transform_4(%arg0: i32) -> (i32, i32) {
    %c0_i32 = arith.constant 0 : i32
    %c0_i32_0 = arith.constant 0 : i32
    %c0_i32_1 = arith.constant 0 : i32
    return %c0_i32, %c0_i32_0 : i32, i32
  }
  func.func @transform_5(%arg0: i32) -> (i32, i32) {
    %c0_i32 = arith.constant 0 : i32
    %c0_i32_0 = arith.constant 0 : i32
    %c0_i32_1 = arith.constant 0 : i32
    return %c0_i32, %c0_i32_0 : i32, i32
  }
  func.func @transform_6(%arg0: i32) -> (i32, i32) {
    %c0_i32 = arith.constant 0 : i32
    %c0_i32_0 = arith.constant 0 : i32
    %c0_i32_1 = arith.constant 0 : i32
    return %c0_i32, %c0_i32_0 : i32, i32
  }
  func.func @transform_7(%arg0: i32) -> (i32, i32) {
    %c0_i32 = arith.constant 0 : i32
    %c0_i32_0 = arith.constant 0 : i32
    %c0_i32_1 = arith.constant 0 : i32
    return %c0_i32, %c0_i32_0 : i32, i32
  }
  func.func @transform_8(%arg0: i32) -> (i32, i32) {
    %c0_i32 = arith.constant 0 : i32
    %c0_i32_0 = arith.constant 0 : i32
    %c0_i32_1 = arith.constant 0 : i32
    return %c0_i32, %c0_i32_0 : i32, i32
  }
  func.func @transform_9(%arg0: i32) -> (i32, i32) {
    %c0_i32 = arith.constant 0 : i32
    %c0_i32_0 = arith.constant 0 : i32
    %c0_i32_1 = arith.constant 0 : i32
    return %c0_i32, %c0_i32_0 : i32, i32
  }
  func.func @transform_10(%arg0: i32) -> (i32, i32) {
    %c0_i32 = arith.constant 0 : i32
    %c0_i32_0 = arith.constant 0 : i32
    %c0_i32_1 = arith.constant 0 : i32
    return %c0_i32, %c0_i32_0 : i32, i32
  }
  func.func @transform_11(%arg0: i32) -> (i32, i32) {
    %c0_i32 = arith.constant 0 : i32
    %c0_i32_0 = arith.constant 0 : i32
    %c0_i32_1 = arith.constant 0 : i32
    return %c0_i32, %c0_i32_0 : i32, i32
  }
  func.func @transform_12(%arg0: i32) -> (i32, i32) {
    %c0_i32 = arith.constant 0 : i32
    %c0_i32_0 = arith.constant 0 : i32
    %c0_i32_1 = arith.constant 0 : i32
    return %c0_i32, %c0_i32_0 : i32, i32
  }
  func.func @transform_13(%arg0: i32) -> (i32, i32, i32) {
    %c0_i32 = arith.constant 0 : i32
    %c0_i32_0 = arith.constant 0 : i32
    %c0_i32_1 = arith.constant 0 : i32
    return %arg0, %c0_i32, %c0_i32_0 : i32, i32, i32
  }
}

</mosaic_0001>

<bundles_post_ra>
// kernel: two_modal_layer.1
= control target key start
LH: loop header
LB: loop body
LE: loop exit
PB: predicated region body
PF: predicated region fallthrough
CT: control target
= control target key end

     0   :  { %s2498_s25 = smov 0   ;;  %s2936_s0 = inlined_call_operand.vmem [shape: f32[2,24,128], index: 0, kind: input, shape index: {}]   ;;  %s2937_s1 = inlined_call_operand.vmem [shape: bf16[128,384], index: 1, kind: input, shape index: {}]   ;;  %s2938_s2 = inlined_call_operand.vmem [shape: f32[1,384], index: 2, kind: input, shape index: {}]   ;;  %s2939_s3 = inlined_call_operand.vmem [shape: bf16[128,128], index: 3, kind: input, shape index: {}]   ;;  %s2940_s4 = inlined_call_operand.vmem [shape: f32[1,128], index: 4, kind: input, shape index: {}]   ;;  %s2941_s5 = inlined_call_operand.vmem [shape: f32[1,128], index: 5, kind: input, shape index: {}]   ;;  %s2942_s6 = inlined_call_operand.vmem [shape: f32[1,128], index: 6, kind: input, shape index: {}]   ;;  %s2943_s7 = inlined_call_operand.vmem [shape: bf16[128,512], index: 7, kind: input, shape index: {}]   ;;  %s2944_s8 = inlined_call_operand.vmem [shape: f32[1,512], index: 8, kind: input, shape index: {}]   ;;  %s2945_s9 = inlined_call_operand.vmem [shape: bf16[512,128], index: 9, kind: input, shape index: {}]   ;;  %s2946_s10 = inlined_call_operand.vmem [shape: f32[1,128], index: 10, kind: input, shape index: {}]   ;;  %s2947_s11 = inlined_call_operand.vmem [shape: f32[1,128], index: 11, kind: input, shape index: {}]   ;;  %s2948_s12 = inlined_call_operand.vmem [shape: f32[1,128], index: 12, kind: input, shape index: {}]   ;;  %s2949_s13 = inlined_call_operand.vmem [shape: f32[2,24,128], index: 13, kind: output, shape index: {}]  }
   0x1 LB: > { %s1976_s26 = sadd.s32 4294967295, %s2423_s25   ;;  %p1980_p0 = scmp.ge.s32.totalorder %s2423_s25, 1  ;;  %s2423_s25 = sphi %s2498_s25, %s23_s25  }
   0x2   : > { %p387_p1 = scmp.lt.s32.totalorder %s2423_s25, 3 }
   0x4   : > { %p388_p2 = pnand %p1980_p0, %p387_p1 }
   0x5   : > { %v2249_v0 = vld [vmem:[%s2937_s1 + $0x4] ss:$12 sps:$4 sm:$0xff] (!%p388_p2)   ;;  %p431_p3 = scmp.lt.s32.totalorder (!%p388_p2), %s1976_s26, 1  ;;  %v2251_v1 = vld [vmem:[%s2937_s1] ss:$12 sps:$4 sm:$0xff] (!%p388_p2)   ;;  %v2425_v2 = vmov (!%p388_p2), 0   ;;  %v481_v31 = vlaneseq (!%p388_p2) }
   0x6   : > { %391 = sbr.rel (%p388_p2) target bundleno = 2335 (0x91f), region = 72  ;;  %656 = vmatprep.mubr.bf16.mxu0 (!%p388_p2), %v2425_v2  ;;  %624 = vmatprep.subr.bf16.mxu0 (!%p388_p2), %v2249_v0  ;;  %v2252_v3 = vld [vmem:[%s2937_s1 + $0x1c] ss:$12 sps:$4 sm:$0xff] (!%p388_p2)   ;;  %v2254_v4 = vld [vmem:[%s2937_s1 + $0x18] ss:$12 sps:$4 sm:$0xff] (!%p388_p2)   ;;  %v2426_v30 = vmov (!%p388_p2), 0.0  }
   0x7   : > { %625 = vmatpush1.bf16.msra.mxu0 (!%p388_p2), %v2251_v1  ;;  %v2255_v5 = vld [vmem:[%s2937_s1 + $0x34] ss:$12 sps:$4 sm:$0xff] (!%p388_p2)   ;;  %v2257_v6 = vld [vmem:[%s2937_s1 + $0x30] ss:$12 sps:$4 sm:$0xff] (!%p388_p2)   ;;  %v2258_v7 = vld [vmem:[%s2937_s1 + $0x4c] ss:$12 sps:$4 sm:$0xff] (!%p388_p2)  }
   0x8   : > { %626 = vmatprep.subr.bf16.mxu0 (!%p388_p2), %v2252_v3  ;;  %v2260_v8 = vld [vmem:[%s2937_s1 + $0x48] ss:$12 sps:$4 sm:$0xff] (!%p388_p2)   ;;  %v2261_v10 = vld [vmem:[%s2937_s1 + $0x64] ss:$12 sps:$4 sm:$0xff] (!%p388_p2)   ;;  %v2274_v14 = vld [vmem:[%s2937_s1 + $0x20] ss:$12 sps:$4 sm:$0xff] (!%p388_p2)  }
   0x9   : > { %v2273_v13 = vld [vmem:[%s2937_s1 + $0x8] ss:$12 sps:$4 sm:$0xff] (!%p388_p2)   ;;  %v2263_v15 = vld [vmem:[%s2937_s1 + $0x60] ss:$12 sps:$4 sm:$0xff] (!%p388_p2)   ;;  %v2275_v17 = vld [vmem:[%s2937_s1 + $0x38] ss:$12 sps:$4 sm:$0xff] (!%p388_p2)  }
   0xa   : > { %2173 = vmatprep.subr.bf16.mxu1 (!%p388_p2), %v2273_v13  ;;  %v2264_v16 = vld [vmem:[%s2937_s1 + $0x7c] ss:$12 sps:$4 sm:$0xff] (!%p388_p2)   ;;  %v2266_v18 = vld [vmem:[%s2937_s1 + $0x78] ss:$12 sps:$4 sm:$0xff] (!%p388_p2)   ;;  %v2267_v19 = vld [vmem:[%s2937_s1 + $0x94] ss:$12 sps:$4 sm:$0xff] (!%p388_p2)  }
   0xb   : > { %627 = vmatpush1.bf16.msra.mxu0 (!%p388_p2), %v2254_v4  ;;  %2174 = vmatpush3.bf16.msra.mxu1 (!%p388_p2), %v2273_v13  ;;  %v2276_v20 = vld [vmem:[%s2937_s1 + $0x50] ss:$12 sps:$4 sm:$0xff] (!%p388_p2)   ;;  %v2270_v22 = vld [vmem:[%s2937_s1 + $0xac] ss:$12 sps:$4 sm:$0xff] (!%p388_p2)   ;;  %v2277_v23 = vld [vmem:[%s2937_s1 + $0x68] ss:$12 sps:$4 sm:$0xff] (!%p388_p2)  }
   0xc   : > { %628 = vmatprep.subr.bf16.mxu0 (!%p388_p2), %v2255_v5  ;;  %2175 = vmatprep.subr.bf16.mxu1 (!%p388_p2), %v2274_v14  ;;  %v2269_v21 = vld [vmem:[%s2937_s1 + $0x90] ss:$12 sps:$4 sm:$0xff] (!%p388_p2)   ;;  %v2272_v24 = vld [vmem:[%s2937_s1 + $0xa8] ss:$12 sps:$4 sm:$0xff] (!%p388_p2)   ;;  %v2278_v25 = vld [vmem:[%s2937_s1 + $0x80] ss:$12 sps:$4 sm:$0xff] (!%p388_p2)  }
   0xd   : > { %s2951_s26 = smov (!%p431_p3, %s1976_s26), 1  ;;  %v2279_v26 = vld [vmem:[%s2937_s1 + $0x98] ss:$12 sps:$4 sm:$0xff]   ;;  %v2280_v28 = vld [vmem:[%s2937_s1 + $0xb0] ss:$12 sps:$4 sm:$0xff]   ;;  %vm2427_vm0 = vmmov 0  }
   0xe   : > { %s2237_s20 = smul.u32 24, %s2951_s26  ;;  %v2609_v32 = vshrl.u32 %v481_v31, 7  ;;  %v479_v34 = vld [vmem:[%s2938_s2] sm:$0x7]  ;;  %vm866_vm1 = vcmask 64512   ;;  %vm769_vm2 = vcmask 130048  }
   0xf   : > { %629 = vmatpush1.bf16.msra.mxu0 %v2257_v6  ;;  %2176 = vmatpush3.bf16.msra.mxu1 %v2274_v14  ;;  %vm893_vm3 = vcmask 1043456  }
  0x10   : > { %s2533_s27 = scalar_lea.vmem %s2936_s0, %s2237_s20  ;;  %630 = vmatprep.subr.bf16.mxu0 %v2258_v7  ;;  %2177 = vmatprep.subr.bf16.mxu1 %v2275_v17  ;;  %v487_v33 = vsub.s32 1, %v2609_v32  ;;  %v483_v40 = vsub.s32 0, %v2609_v32  ;;  %v491_v43 = vsub.s32 2, %v2609_v32  ;;  %s440_s15 = scalar_lea.vmem %s2949_s13, %s2237_s20 }
  0x11   : > { %v2542_v9 = vld [vmem:[%s2533_s27] sm:$0xff]  ;;  %v2548_v11 = vld [vmem:[%s2533_s27 + $0x8] sm:$0xff]  ;;  %v2595_v27 = vld [vmem:[%s2533_s27 + $0x10] sm:$0xff] }
  0x12   : > { %v445_v12 = vpack.c.bf16 %v2548_v11, %v2542_v9  ;;  %v446_v29 = vpack.c.bf16 %v2595_v27, %v2595_v27  ;;  %v488_v35 = vrot.slane %v479_v34, %v487_v33  ;;  %v484_v44 = vrot.slane %v479_v34, %v483_v40 }
  0x13   : > { %631 = vmatpush1.bf16.msra.mxu0 %v2260_v8  ;;  %2178 = vmatpush3.bf16.msra.mxu1 %v2275_v17  ;;  %v492_v52 = vrot.slane %v479_v34, %v491_v43 }
  0x14   : > { %2189 = vmatprep.mubr.bf16.mxu1 %v445_v12  ;;  %632 = vmatprep.subr.bf16.mxu0 %v2261_v10 }
  0x15   : > { %2179 = vmatprep.subr.bf16.mxu1 %v2276_v20 }
  0x17   : > { %633 = vmatpush1.bf16.msra.mxu0 %v2263_v15  ;;  %2180 = vmatpush3.bf16.msra.mxu1 %v2276_v20 }
  0x18   : > { %634 = vmatprep.subr.bf16.mxu0 %v2264_v16  ;;  %2181 = vmatprep.subr.bf16.mxu1 %v2277_v23 }
  0x1b   : > { %635 = vmatpush1.bf16.msra.mxu0 %v2266_v18  ;;  %2182 = vmatpush3.bf16.msra.mxu1 %v2277_v23 }
  0x1c   : > { %636 = vmatprep.subr.bf16.mxu0 %v2267_v19  ;;  %2183 = vmatprep.subr.bf16.mxu1 %v2278_v25 }
  0x1f   : > { %637 = vmatpush1.bf16.msra.mxu0 %v2269_v21  ;;  %2184 = vmatpush3.bf16.msra.mxu1 %v2278_v25 }
  0x20   : > { %638 = vmatprep.subr.bf16.mxu0 %v2270_v22  ;;  %2185 = vmatprep.subr.bf16.mxu1 %v2279_v26 }
  0x23   : > { %639 = vmatpush1.bf16.msra.mxu0 %v2272_v24  ;;  %2186 = vmatpush3.bf16.msra.mxu1 %v2279_v26 }
  0x24   : > { %2187 = vmatprep.subr.bf16.mxu1 %v2280_v28  ;;  %2193 = vmatprep.subr.bf16.mxu0 %v2426_v30 }
  0x26   : > { %657 = vmatmul.mubr.bf16.vlgmr.msra.gmra.mrb[0].mxu0 %v445_v12 }
  0x27   : > { %666 = vmatprep.mubr.bf16.mxu0 %v2425_v2  ;;  %2188 = vmatpush3.bf16.msra.mxu1 %v2280_v28 }
  0x28   : > { %2205 = vmatprep.subr.bf16.mxu1 %v2426_v30 }
  0x2a   : > { %2190 = vmatmul.mubr.bf16.vlgmr.msra.gmra.mrb[0].mxu1 %v446_v29 }
  0x2b   : > { %2207 = vmatprep.mubr.msk.bf16.mxu1 %vm2427_vm0, %v2426_v30 }
  0x2e   : > { %667 = vmatmul.mubr.bf16.gmra.mrb[4].mxu0 %v446_v29 }
  0x2f   : > { %2195 = vmatprep.mubr.msk.bf16.mxu0 %vm2427_vm0, %v2426_v30 }
  0xf9   : > { %v658_v36 = vpop.f32.mrb[0].mxu0 }
  0xfa   : > { %v660_v37 = vpop.f32.mrb[1].mxu0  ;;  %v659_v61 = vadd.f32 %v658_v36, %v484_v44  ;;  %v2282_v36 = vld [vmem:[%s2939_s3 + $0x8] sm:$0xff]  }
  0xfb   : > { %v661_v38 = vadd.f32 %v660_v37, %v488_v35  ;;  %v662_v39 = vpop.f32.mrb[2].mxu0  ;;  %v2283_v37 = vld [vmem:[%s2939_s3 + $0x10] sm:$0xff]  }
  0xfc   : > { %v664_v41 = vpop.f32.mrb[3].mxu0  ;;  %v663_v46 = vadd.f32 %v662_v39, %v484_v44  ;;  %v723_v1 = vpack.c.bf16 %v659_v61, %v659_v61  ;;  %v2285_v39 = vld [vmem:[%s2939_s3 + $0x20] sm:$0xff]  }
  0xfd   : > { %v725_v42 = vpack.c.bf16 %v661_v38, %v661_v38  ;;  %v665_v49 = vadd.f32 %v664_v41, %v488_v35  ;;  %v2191_v56 = vpop.f32.mrb[0].mxu1  ;;  %v2284_v38 = vld [vmem:[%s2939_s3 + $0x18] sm:$0xff]  }
  0xfe   : > { %v709_v57 = vpop.f32.mrb[1].mxu1  ;;  %v718_v58 = vadd.f32 %v2191_v56, %v492_v52  ;;  %v2287_v56 = vld [vmem:[%s2939_s3 + $0x30] sm:$0xff]  }
  0xff   : > { %2206 = vmatpush3.bf16.xpose.msra.mxu1 %v725_v42  ;;  %v2623_v59 = vadd.f32 %v709_v57, %v492_v52  ;;  %v2192_v60 = vpop.f32.mrb[2].mxu1 }
 0x100   : > { %v712_v62 = vpop.f32.mrb[3].mxu1 }
 0x101   : > { %v668_v45 = vpop.f32.mrb[4].mxu0  ;;  %v713_v63 = vadd.f32 %v712_v62, %v492_v52 }
 0x102   : > { %v669_v47 = vadd.f32 %v668_v45, %v484_v44  ;;  %v670_v48 = vpop.f32.mrb[5].mxu0 }
 0x103   : > { %v671_v50 = vadd.f32 %v670_v48, %v488_v35  ;;  %v672_v51 = vpop.f32.mrb[6].mxu0  ;;  %v728_v0 = vpack.c.bf16 %v718_v58, %v713_v63  ;;  %v2281_v35 = vld [vmem:[%s2939_s3] sm:$0xff]  }
 0x104   : > { %v724_v53 = vpack.c.bf16 %v669_v47, %v663_v46  ;;  %v673_v54 = vpop.f32.mrb[7].mxu0  ;;  %2217 = vmatprep.subr.bf16.mxu1 %v2281_v35  ;;  %v727_v46 = vpack.c.bf16 %v2623_v59, %v2623_v59 }
 0x105   : > { %v726_v55 = vpack.c.bf16 %v671_v50, %v665_v49 }
 0x106   : > { %2208 = vmatmul.mubr.bf16.vlgmr.msra.gmra.mrb[4].mxu1 %v724_v53  ;;  %v895_v51 = vsel %vm893_vm3, %v727_v46, 0  ;;  %v2307_v46 = vld [vmem:[%s2943_s7 + $0x60] ss:$16 sps:$4 sm:$0xff]  }
 0x107   : > { %2194 = vmatpush3.bf16.xpose.msra.mxu0 %v726_v55  ;;  %2218 = vmatpush3.bf16.msra.mxu1 %v2281_v35  ;;  %v2286_v55 = vld [vmem:[%s2939_s3 + $0x28] sm:$0xff]  }
 0x108   : > { %2199 = vmatprep.subr.bf16.mxu0 %v2426_v30  ;;  %2219 = vmatprep.subr.bf16.mxu1 %v2282_v36 }
 0x10b   : > { %2220 = vmatpush3.bf16.msra.mxu1 %v2282_v36 }
 0x10c   : > { %2221 = vmatprep.subr.bf16.mxu1 %v2283_v37 }
 0x10e   : > { %2196 = vmatmul.mubr.bf16.vlgmr.msra.gmra.mrb[8].mxu0 %v723_v1 }
 0x10f   : > { %2200 = vmatpush3.bf16.msra.mxu0 %v728_v0  ;;  %2201 = vmatprep.mubr.msk.bf16.mxu0 %vm2427_vm0, %v2426_v30 }
 0x110   : > { %2211 = vmatprep.subr.bf16.mxu0 %v2426_v30  ;;  %2222 = vmatpush3.bf16.msra.mxu1 %v2283_v37 }
 0x111   : > { %2223 = vmatprep.subr.bf16.mxu1 %v2284_v38 }
 0x114   : > { %2224 = vmatpush3.bf16.msra.mxu1 %v2284_v38  ;;  %v2303_v38 = vld [vmem:[%s2943_s7 + $0x44] ss:$16 sps:$4 sm:$0xff]  }
 0x115   : > { %2225 = vmatprep.subr.bf16.mxu1 %v2285_v39 }
 0x118   : > { %2226 = vmatpush3.bf16.msra.mxu1 %v2285_v39  ;;  %v2306_v39 = vld [vmem:[%s2943_s7 + $0x4c] ss:$16 sps:$4 sm:$0xff]  }
 0x119   : > { %2227 = vmatprep.subr.bf16.mxu1 %v2286_v55 }
 0x11c   : > { %2228 = vmatpush3.bf16.msra.mxu1 %v2286_v55  ;;  %v2322_v55 = vld [vmem:[%s2943_s7 + $0xa8] ss:$16 sps:$4 sm:$0xff]  }
 0x11d   : > { %2229 = vmatprep.subr.bf16.mxu1 %v2287_v56 }
 0x120   : > { %2230 = vmatpush3.bf16.msra.mxu1 %v2287_v56  ;;  %v2327_v56 = vld [vmem:[%s2943_s7 + $0xc4] ss:$16 sps:$4 sm:$0xff]  }
 0x1d9   : > { %v859_v3 = vpop.f32.mrb[4].mxu1 }
 0x1da   : > { %v2209_v4 = vpop.f32.mrb[5].mxu1  ;;  %v867_v15 = vsel %vm866_vm1, %v859_v3, -inf }
 0x1db   : > { %v862_v5 = vpop.f32.mrb[6].mxu1  ;;  %v2009_v4 = vld [vmem:[%s2940_s4] ss:$0 sm:$0xff] }
 0x1dc   : > { %v2210_v6 = vpop.f32.mrb[7].mxu1  ;;  %v870_v7 = vsel %vm866_vm1, %v862_v5, -inf }
 0x1dd   : > { %871 = vmax.xlane.f32.xlu1 %v870_v7 }
 0x1e1   : > { %v763_v8 = vpop.f32.mrb[8].mxu0 }
 0x1e2   : > { %v2197_v10 = vpop.f32.mrb[9].mxu0  ;;  %v770_v12 = vsel %vm769_vm2, %v763_v8, -inf }
 0x1e3   : > { %771 = vmax.xlane.f32.xlu0 %v770_v12  ;;  %v766_v13 = vpop.f32.mrb[10].mxu0 }
 0x1e4   : > { %v2198_v14 = vpop.f32.mrb[11].mxu0 }
 0x1e7   : > { %868 = vmax.xlane.f32.xlu0 %v867_v15 }
 0x26a   : > { %v872_v16 = vpop.xlane.xlu1 %871 }
 0x26b   : > { %v874_v17 = vsub.f32 %v862_v5, %v872_v16 }
 0x26d   : > { %v877_v20 = vmul.f32 1.442695, %v874_v17  ;;  %v2289_v17 = vld [vmem:[%s2943_s7] ss:$16 sps:$4 sm:$0xff]  }
 0x270   : > { %v772_v18 = vpop.xlane.xlu0 %771 }
 0x271   : > { %v773_v19 = vsub.f32 %v763_v8, %v772_v18  ;;  %v2291_v18 = vld [vmem:[%s2943_s7 + $0x4] ss:$16 sps:$4 sm:$0xff]  }
 0x273   : > { %v774_v21 = vmul.f32 1.442695, %v773_v19  ;;  %v2292_v19 = vld [vmem:[%s2943_s7 + $0x8] ss:$16 sps:$4 sm:$0xff]  }
 0x274   : > { %v869_v22 = vpop.xlane.xlu0 %868 }
 0x275   : > { %2369 = vpow2.f32 %v774_v21  ;;  %v873_v23 = vsub.f32 %v859_v3, %v869_v22  ;;  %v2298_v21 = vld [vmem:[%s2943_s7 + $0x28] ss:$16 sps:$4 sm:$0xff]  }
 0x276   : > { %2371 = vpow2.f32 %v877_v20  ;;  %v2295_v20 = vld [vmem:[%s2943_s7 + $0x20] ss:$16 sps:$4 sm:$0xff]  }
 0x277   : > { %v875_v24 = vmul.f32 1.442695, %v873_v23 }
 0x279   : > { %2373 = vpow2.f32 %v875_v24 }
 0x27f   : > { %v2370_v25 = vpop.eup %2369 }
 0x280   : > { %v776_v26 = vsel %vm769_vm2, %v2370_v25, 0.0  ;;  %v2372_v28 = vpop.eup %2371 }
 0x281   : > { %777 = vadd.xlane.f32.xlu1 %v776_v26  ;;  %v882_v31 = vsel %vm866_vm1, %v2372_v28, 0.0 }
 0x283   : > { %v2374_v29 = vpop.eup %2373 }
 0x284   : > { %v879_v34 = vsel %vm866_vm1, %v2374_v29, 0.0 }
 0x285   : > { %883 = vadd.xlane.f32.xlu1 %v882_v31  ;;  %880 = vadd.xlane.f32.xlu0 %v879_v34 }
 0x30e   : > { %v778_v41 = vpop.xlane.xlu1 %777 }
 0x30f   : > { %2375 = vrcp.f32 %v778_v41  ;;  %v2301_v41 = vld [vmem:[%s2943_s7 + $0x40] ss:$16 sps:$4 sm:$0xff]  }
 0x312   : > { %v884_v42 = vpop.xlane.xlu1 %883  ;;  %v881_v44 = vpop.xlane.xlu0 %880 }
 0x313   : > { %2377 = vrcp.f32 %v884_v42  ;;  %v2304_v42 = vld [vmem:[%s2943_s7 + $0x48] ss:$16 sps:$4 sm:$0xff]  }
 0x314   : > { %2379 = vrcp.f32 %v881_v44  ;;  %v2309_v44 = vld [vmem:[%s2943_s7 + $0x64] ss:$16 sps:$4 sm:$0xff]  }
 0x319   : > { %v2376_v45 = vpop.eup %2375 }
 0x31a   : > { %v780_v47 = vmul.f32 %v2376_v45, %v2370_v25  ;;  %v2312_v45 = vld [vmem:[%s2943_s7 + $0x6c] ss:$16 sps:$4 sm:$0xff]  }
 0x31c   : > { %v781_v48 = vpack.c.bf16 %v780_v47, %v780_v47  ;;  %v2310_v47 = vld [vmem:[%s2943_s7 + $0x68] ss:$16 sps:$4 sm:$0xff]  }
 0x31d   : > { %v2378_v49 = vpop.eup %2377 }
 0x31e   : > { %v2380_v50 = vpop.eup %2379  ;;  %2202 = vmatmul.mubr.msk.bf16.vlgmr.msra.gmra.mrb[12].mxu0 %vm769_vm2, %v781_v48  ;;  %v888_v52 = vmul.f32 %v2378_v49, %v2372_v28  ;;  %v2315_v48 = vld [vmem:[%s2943_s7 + $0x84] ss:$16 sps:$4 sm:$0xff]   ;;  %v2318_v49 = vld [vmem:[%s2943_s7 + $0x8c] ss:$16 sps:$4 sm:$0xff]  }
 0x31f   : > { %2212 = vmatpush3.bf16.msra.mxu0 %v895_v51  ;;  %2213 = vmatprep.mubr.msk.bf16.mxu0 %vm2427_vm0, %v2426_v30  ;;  %v887_v53 = vmul.f32 %v2380_v50, %v2374_v29  ;;  %v2288_v30 = vld [vmem:[%s2939_s3 + $0x38] sm:$0xff]   ;;  %v2313_v50 = vld [vmem:[%s2943_s7 + $0x80] ss:$16 sps:$4 sm:$0xff]  }
 0x320   : > { %2231 = vmatprep.subr.bf16.mxu1 %v2288_v30  ;;  %1332 = vmatprep.subr.bf16.mxu0 %v2291_v18  ;;  %v2316_v51 = vld [vmem:[%s2943_s7 + $0x88] ss:$16 sps:$4 sm:$0xff]  }
 0x321   : > { %v889_v54 = vpack.c.bf16 %v888_v52, %v887_v53  ;;  %2232 = vmatpush3.bf16.msra.mxu1 %v2288_v30  ;;  %v2321_v52 = vld [vmem:[%s2943_s7 + $0xa4] ss:$16 sps:$4 sm:$0xff]   ;;  %v2324_v53 = vld [vmem:[%s2943_s7 + $0xac] ss:$16 sps:$4 sm:$0xff]  }
 0x322   : > { %v2330_v30 = vld [vmem:[%s2943_s7 + $0xcc] ss:$16 sps:$4 sm:$0xff]  }
 0x326   : > { %2214 = vmatmul.mubr.msk.bf16.vlgmr.msra.gmra.mrb[16].mxu0 %vm866_vm1, %v889_v54  ;;  %v2319_v54 = vld [vmem:[%s2943_s7 + $0xa0] ss:$16 sps:$4 sm:$0xff]  }
 0x327   : > { %1364 = vmatprep.mubr.bf16.mxu0 %v2425_v2  ;;  %1333 = vmatpush1.bf16.msra.mxu0 %v2289_v17 }
 0x3f1   : > { %v819_v57 = vpop.f32.mrb[12].mxu0 }
 0x3f2   : > { %v2203_v58 = vpop.f32.mrb[13].mxu0 }
 0x3f3   : > { %v822_v59 = vpop.f32.mrb[14].mxu0  ;;  %v2328_v58 = vld [vmem:[%s2943_s7 + $0xc8] ss:$16 sps:$4 sm:$0xff]  }
 0x3f4   : > { %v2204_v60 = vpop.f32.mrb[15].mxu0  ;;  %v2333_v59 = vld [vmem:[%s2943_s7 + $0xe4] ss:$16 sps:$4 sm:$0xff]  }
 0x3f5   : > { %v2336_v60 = vld [vmem:[%s2943_s7 + $0xec] ss:$16 sps:$4 sm:$0xff]  }
 0x3f9   : > { %v931_v61 = vpop.f32.mrb[16].mxu0 }
 0x3fa   : > { %v938_v62 = vpack.c.bf16 %v931_v61, %v819_v57  ;;  %v2215_v63 = vpop.f32.mrb[17].mxu0  ;;  %v2325_v57 = vld [vmem:[%s2943_s7 + $0xc0] ss:$16 sps:$4 sm:$0xff]  }
 0x3fb   : > { %v934_v0 = vpop.f32.mrb[18].mxu0  ;;  %v2331_v61 = vld [vmem:[%s2943_s7 + $0xe0] ss:$16 sps:$4 sm:$0xff]  }
 0x3fc   : > { %v939_v1 = vpack.c.bf16 %v934_v0, %v934_v0  ;;  %v2216_v3 = vpop.f32.mrb[19].mxu0  ;;  %2233 = vmatprep.mubr.bf16.mxu1 %v938_v62  ;;  %v2334_v62 = vld [vmem:[%s2943_s7 + $0xe8] ss:$16 sps:$4 sm:$0xff]   ;;  %v2337_v63 = vld [vmem:[%s2945_s9 + $0x40] sm:$0xff]  }
 0x3fd   : > { %v2338_v0 = vld [vmem:[%s2945_s9 + $0xc0] sm:$0xff]  }
 0x3fe   : > { %2234 = vmatmul.mubr.bf16.vlgmr.msra.gmra.mrb[8].mxu1 %v939_v1 }
 0x3ff   : > { %1415 = vmatprep.mubr.bf16.mxu1 %v2425_v2 }
 0x4d1   : > { %v2235_v5 = vpop.f32.mrb[8].mxu1 }
 0x4d2   : > { %v1045_v6 = vpop.f32.mrb[9].mxu1  ;;  %v1054_v12 = vadd.f32 %v2235_v5, %v2009_v4 }
 0x4d3   : > { %v1046_v7 = vadd.f32 %v2009_v4, %v1045_v6  ;;  %v2236_v8 = vpop.f32.mrb[10].mxu1 }
 0x4d4   : > { %v1048_v10 = vpop.f32.mrb[11].mxu1  ;;  %v1061_v16 = vadd.f32 %v1054_v12, %v2595_v27  ;;  %v2300_v27 = vld [vmem:[%s2943_s7 + $0x2c] ss:$16 sps:$4 sm:$0xff]  }
 0x4d5   : > { %v1049_v13 = vadd.f32 %v2009_v4, %v1048_v10  ;;  %v1059_v14 = vadd.f32 %v1046_v7, %v2542_v9  ;;  %v2294_v9 = vld [vmem:[%s2943_s7 + $0xc] ss:$16 sps:$4 sm:$0xff]  }
 0x4d6   : > { %1383 = vmatprep.subr.bf16.mxu1 %v2294_v9  ;;  %v2019_v9 = vld [vmem:[%s2942_s6] ss:$0 sm:$0xff] }
 0x4d7   : > { %1064 = vadd.xlane.f32.xlu0 %v1059_v14  ;;  %v1060_v15 = vadd.f32 %v1049_v13, %v2548_v11  ;;  %v2297_v11 = vld [vmem:[%s2943_s7 + $0x24] ss:$16 sps:$4 sm:$0xff]   ;;  %1384 = vmatpush1.bf16.msra.mxu1 %v2292_v19 }
 0x4d8   : > { %1334 = vmatprep.subr.bf16.mxu0 %v2297_v11  ;;  %1385 = vmatprep.subr.bf16.mxu1 %v2300_v27 }
 0x4d9   : > { %1066 = vadd.xlane.f32.xlu1 %v1060_v15  ;;  %1335 = vmatpush1.bf16.msra.mxu0 %v2295_v20 }
 0x4da   : > { %1336 = vmatprep.subr.bf16.mxu0 %v2303_v38  ;;  %v2348_v38 = vld [vmem:[%s2945_s9 + $0x90] sm:$0xff]  }
 0x4db   : > { %1068 = vadd.xlane.f32.xlu0 %v1061_v16  ;;  %1386 = vmatpush1.bf16.msra.mxu1 %v2298_v21 }
 0x4dc   : > { %1387 = vmatprep.subr.bf16.mxu1 %v2306_v39  ;;  %v2349_v39 = vld [vmem:[%s2945_s9 + $0x58] sm:$0xff]  }
 0x4dd   : > { %1337 = vmatpush1.bf16.msra.mxu0 %v2301_v41  ;;  %v2350_v41 = vld [vmem:[%s2945_s9 + $0xd8] sm:$0xff]  }
 0x4de   : > { %1338 = vmatprep.subr.bf16.mxu0 %v2309_v44  ;;  %v2352_v44 = vld [vmem:[%s2945_s9 + $0x98] sm:$0xff]  }
 0x4df   : > { %1388 = vmatpush1.bf16.msra.mxu1 %v2304_v42  ;;  %v2351_v42 = vld [vmem:[%s2945_s9 + $0x18] sm:$0xff]  }
 0x4e0   : > { %1389 = vmatprep.subr.bf16.mxu1 %v2312_v45  ;;  %v2353_v45 = vld [vmem:[%s2945_s9 + $0x60] sm:$0xff]  }
 0x4e1   : > { %1339 = vmatpush1.bf16.msra.mxu0 %v2307_v46  ;;  %v2354_v46 = vld [vmem:[%s2945_s9 + $0xe0] sm:$0xff]  }
 0x4e2   : > { %1340 = vmatprep.subr.bf16.mxu0 %v2315_v48  ;;  %v2356_v48 = vld [vmem:[%s2945_s9 + $0xa0] sm:$0xff]  }
 0x4e3   : > { %1390 = vmatpush1.bf16.msra.mxu1 %v2310_v47  ;;  %v2355_v47 = vld [vmem:[%s2945_s9 + $0x20] sm:$0xff]  }
 0x4e4   : > { %1391 = vmatprep.subr.bf16.mxu1 %v2318_v49  ;;  %v2357_v49 = vld [vmem:[%s2945_s9 + $0x68] sm:$0xff]  }
 0x4e5   : > { %1341 = vmatpush1.bf16.msra.mxu0 %v2313_v50  ;;  %v2358_v50 = vld [vmem:[%s2945_s9 + $0xe8] sm:$0xff]  }
 0x4e6   : > { %1342 = vmatprep.subr.bf16.mxu0 %v2321_v52  ;;  %v2360_v52 = vld [vmem:[%s2945_s9 + $0xa8] sm:$0xff]  }
 0x4e7   : > { %1392 = vmatpush1.bf16.msra.mxu1 %v2316_v51  ;;  %v2359_v51 = vld [vmem:[%s2945_s9 + $0x28] sm:$0xff]  }
 0x4e8   : > { %1393 = vmatprep.subr.bf16.mxu1 %v2324_v53  ;;  %v2361_v53 = vld [vmem:[%s2945_s9 + $0x70] sm:$0xff]  }
 0x4e9   : > { %1343 = vmatpush1.bf16.msra.mxu0 %v2319_v54  ;;  %v2362_v54 = vld [vmem:[%s2945_s9 + $0xf0] sm:$0xff]  }
 0x4ea   : > { %1344 = vmatprep.subr.bf16.mxu0 %v2327_v56  ;;  %v2364_v56 = vld [vmem:[%s2945_s9 + $0xb0] sm:$0xff]  }
 0x4eb   : > { %1394 = vmatpush1.bf16.msra.mxu1 %v2322_v55  ;;  %v2363_v55 = vld [vmem:[%s2945_s9 + $0x30] sm:$0xff]  }
 0x4ec   : > { %1395 = vmatprep.subr.bf16.mxu1 %v2330_v30  ;;  %v2365_v30 = vld [vmem:[%s2945_s9 + $0x78] sm:$0xff]  }
 0x4ed   : > { %1345 = vmatpush1.bf16.msra.mxu0 %v2325_v57  ;;  %v2366_v57 = vld [vmem:[%s2945_s9 + $0xf8] sm:$0xff]  }
 0x4ee   : > { %1346 = vmatprep.subr.bf16.mxu0 %v2333_v59  ;;  %v2368_v59 = vld [vmem:[%s2945_s9 + $0xb8] sm:$0xff]  }
 0x4ef   : > { %1396 = vmatpush1.bf16.msra.mxu1 %v2328_v58  ;;  %v2367_v58 = vld [vmem:[%s2945_s9 + $0x38] sm:$0xff]  }
 0x4f0   : > { %1397 = vmatprep.subr.bf16.mxu1 %v2336_v60  ;;  %v1150_v60 = vld [vmem:[%s2944_s8] sm:$0xf] }
 0x4f1   : > { %1347 = vmatpush1.bf16.msra.mxu0 %v2331_v61  ;;  %v1166_v61 = vsub.s32 3, %v2609_v32 }
 0x4f2   : > { %2117 = vmatprep.subr.bf16.mxu0 %v2337_v63  ;;  %v1163_v63 = vrot.slane %v1150_v60, %v491_v43 }
 0x4f3   : > { %1398 = vmatpush1.bf16.msra.mxu1 %v2334_v62  ;;  %v1155_v62 = vrot.slane %v1150_v60, %v483_v40 }
 0x4f4   : > { %2145 = vmatprep.subr.bf16.mxu1 %v2338_v0  ;;  %v1159_v0 = vrot.slane %v1150_v60, %v487_v33 }
 0x564   : > { %v1065_v22 = vpop.xlane.xlu0 %1064 }
 0x565   : > { %v1071_v23 = vmul.f32 0.0078125, %v1065_v22 }
 0x566   : > { %v1067_v24 = vpop.xlane.xlu1 %1066 }
 0x567   : > { %v2697_v25 = vsub.f32 %v1059_v14, %v1071_v23  ;;  %v1072_v26 = vmul.f32 0.0078125, %v1067_v24  ;;  %v2018_v14 = vld [vmem:[%s2941_s5] ss:$0 sm:$0xff] }
 0x568   : > { %v1069_v28 = vpop.xlane.xlu0 %1068  ;;  %v2339_v24 = vld [vmem:[%s2945_s9] sm:$0xff]  }
 0x569   : > { %v2699_v29 = vsub.f32 %v1060_v15, %v1072_v26  ;;  %v1073_v31 = vmul.f32 0.0078125, %v1069_v28  ;;  %v1077_v34 = vmul.f32 %v2697_v25, %v2697_v25  ;;  %v2341_v26 = vld [vmem:[%s2945_s9 + $0x48] sm:$0xff]  }
 0x56a   : > { %v2342_v28 = vld [vmem:[%s2945_s9 + $0xc8] sm:$0xff]  }
 0x56b   : > { %v2703_v35 = vsub.f32 %v1061_v16, %v1073_v31  ;;  %1080 = vadd.xlane.f32.xlu1 %v1077_v34  ;;  %v1078_v36 = vmul.f32 %v2699_v29, %v2699_v29  ;;  %v2343_v31 = vld [vmem:[%s2945_s9 + $0x8] sm:$0xff]  }
 0x56c   : > { %v2344_v34 = vld [vmem:[%s2945_s9 + $0x88] sm:$0xff]  }
 0x56d   : > { %1082 = vadd.xlane.f32.xlu0 %v1078_v36  ;;  %v1079_v37 = vmul.f32 %v2703_v35, %v2703_v35  ;;  %v2346_v36 = vld [vmem:[%s2945_s9 + $0xd0] sm:$0xff]  }
 0x56f   : > { %1084 = vadd.xlane.f32.xlu1 %v1079_v37  ;;  %v2347_v37 = vld [vmem:[%s2945_s9 + $0x10] sm:$0xff]  }
 0x5f8   : > { %v1081_v1 = vpop.xlane.xlu1 %1080 }
 0x5f9   : > { %v1086_v3 = vmul.f32 0.0078125, %v1081_v1  ;;  %v1167_v1 = vrot.slane %v1150_v60, %v1166_v61 }
 0x5fa   : > { %v1083_v4 = vpop.xlane.xlu0 %1082 }
 0x5fb   : > { %v1089_v5 = vadd.f32 1e-12, %v1086_v3  ;;  %v1087_v6 = vmul.f32 0.0078125, %v1083_v4 }
 0x5fc   : > { %v1085_v7 = vpop.xlane.xlu1 %1084 }
 0x5fd   : > { %2381 = vrsqrt.f32 %v1089_v5  ;;  %v1090_v8 = vadd.f32 1e-12, %v1087_v6  ;;  %v1088_v10 = vmul.f32 0.0078125, %v1085_v7 }
 0x5ff   : > { %2383 = vrsqrt.f32 %v1090_v8  ;;  %v1091_v12 = vadd.f32 1e-12, %v1088_v10 }
 0x601   : > { %2385 = vrsqrt.f32 %v1091_v12 }
 0x607   : > { %v2382_v13 = vpop.eup %2381 }
 0x608   : > { %v1095_v15 = vmul.f32 %v2382_v13, %v2697_v25  ;;  %v2340_v25 = vld [vmem:[%s2945_s9 + $0x80] sm:$0xff]  }
 0x609   : > { %v2384_v16 = vpop.eup %2383 }
 0x60a   : > { %v1096_v17 = vmul.f32 %v2384_v16, %v2699_v29  ;;  %v1104_v18 = vmul.f32 %v2018_v14, %v1095_v15 }
 0x60b   : > { %v2386_v19 = vpop.eup %2385 }
 0x60c   : > { %v1105_v11 = vmul.f32 %v2018_v14, %v1096_v17  ;;  %v1097_v27 = vmul.f32 %v2386_v19, %v2703_v35  ;;  %v2796_v20 = vadd.f32 %v2019_v9, %v1104_v18 }
 0x60e   : > { %v2798_v21 = vadd.f32 %v2019_v9, %v1105_v11  ;;  %v1106_v23 = vmul.f32 %v2018_v14, %v1097_v27 }
 0x610   : > { %v1116_v22 = vpack.c.bf16 %v2798_v21, %v2796_v20  ;;  %v2816_v29 = vadd.f32 %v2019_v9, %v1106_v23 }
 0x612   : > { %1365 = vmatmul.mubr.bf16.vlgmr.msra.gmra.mrb[20].mxu0 %v1116_v22  ;;  %1416 = vmatmul.mubr.bf16.vlgmr.msra.gmra.mrb[12].mxu1 %v1116_v22  ;;  %v1117_v35 = vpack.c.bf16 %v2816_v29, %v2816_v29 }
 0x613   : > { %1374 = vmatprep.mubr.bf16.mxu0 %v2425_v2  ;;  %1425 = vmatprep.mubr.bf16.mxu1 %v2425_v2  ;;  %v2345_v2 = vld [vmem:[%s2945_s9 + $0x50] sm:$0xff]  }
 0x614   : > { %2118 = vmatpush3.bf16.msra.mxu0 %v2339_v24  ;;  %2146 = vmatpush3.bf16.msra.mxu1 %v2340_v25 }
 0x615   : > { %2119 = vmatprep.subr.bf16.mxu0 %v2341_v26  ;;  %2147 = vmatprep.subr.bf16.mxu1 %v2342_v28 }
 0x618   : > { %2120 = vmatpush3.bf16.msra.mxu0 %v2343_v31  ;;  %2148 = vmatpush3.bf16.msra.mxu1 %v2344_v34 }
 0x619   : > { %2121 = vmatprep.subr.bf16.mxu0 %v2345_v2  ;;  %2149 = vmatprep.subr.bf16.mxu1 %v2346_v36 }
 0x61a   : > { %1375 = vmatmul.mubr.bf16.gmra.mrb[24].mxu0 %v1117_v35  ;;  %1426 = vmatmul.mubr.bf16.gmra.mrb[16].mxu1 %v1117_v35 }
 0x61c   : > { %2122 = vmatpush3.bf16.msra.mxu0 %v2347_v37  ;;  %2150 = vmatpush3.bf16.msra.mxu1 %v2348_v38 }
 0x61d   : > { %2123 = vmatprep.subr.bf16.mxu0 %v2349_v39  ;;  %2151 = vmatprep.subr.bf16.mxu1 %v2350_v41 }
 0x620   : > { %2124 = vmatpush3.bf16.msra.mxu0 %v2351_v42  ;;  %2152 = vmatpush3.bf16.msra.mxu1 %v2352_v44 }
 0x621   : > { %2125 = vmatprep.subr.bf16.mxu0 %v2353_v45  ;;  %2153 = vmatprep.subr.bf16.mxu1 %v2354_v46 }
 0x624   : > { %2126 = vmatpush3.bf16.msra.mxu0 %v2355_v47  ;;  %2154 = vmatpush3.bf16.msra.mxu1 %v2356_v48 }
 0x625   : > { %2127 = vmatprep.subr.bf16.mxu0 %v2357_v49  ;;  %2155 = vmatprep.subr.bf16.mxu1 %v2358_v50 }
 0x628   : > { %2128 = vmatpush3.bf16.msra.mxu0 %v2359_v51  ;;  %2156 = vmatpush3.bf16.msra.mxu1 %v2360_v52 }
 0x629   : > { %2129 = vmatprep.subr.bf16.mxu0 %v2361_v53  ;;  %2157 = vmatprep.subr.bf16.mxu1 %v2362_v54 }
 0x62c   : > { %2130 = vmatpush3.bf16.msra.mxu0 %v2363_v55  ;;  %2158 = vmatpush3.bf16.msra.mxu1 %v2364_v56 }
 0x62d   : > { %2131 = vmatprep.subr.bf16.mxu0 %v2365_v30  ;;  %2159 = vmatprep.subr.bf16.mxu1 %v2366_v57 }
 0x630   : > { %2132 = vmatpush3.bf16.msra.mxu0 %v2367_v58  ;;  %2160 = vmatpush3.bf16.msra.mxu1 %v2368_v59 }
 0x6e5   : > { %v1366_v3 = vpop.f32.mrb[20].mxu0  ;;  %v1417_v4 = vpop.f32.mrb[12].mxu1 }
 0x6e6   : > { %v1367_v5 = vadd.f32 %v1366_v3, %v1155_v62  ;;  %v1418_v6 = vadd.f32 %v1417_v4, %v1163_v63  ;;  %v1368_v7 = vpop.f32.mrb[21].mxu0  ;;  %v1419_v8 = vpop.f32.mrb[13].mxu1 }
 0x6e7   : > { %v1369_v10 = vadd.f32 %v1368_v7, %v1159_v0  ;;  %v1420_v12 = vadd.f32 %v1419_v8, %v1167_v1  ;;  %v1370_v13 = vpop.f32.mrb[22].mxu0  ;;  %v1421_v14 = vpop.f32.mrb[14].mxu1 }
 0x6e8   : > { %v1447_v15 = vmul.f32 0.70710677, %v1367_v5  ;;  %v1449_v16 = vmul.f32 0.70710677, %v1418_v6  ;;  %v1371_v43 = vadd.f32 %v1370_v13, %v1155_v62  ;;  %v1422_v18 = vadd.f32 %v1421_v14, %v1163_v63  ;;  %v1372_v32 = vpop.f32.mrb[23].mxu0  ;;  %v1423_v33 = vpop.f32.mrb[15].mxu1 }
 0x6e9   : > { %v1448_v40 = vmul.f32 0.70710677, %v1369_v10  ;;  %v1450_v17 = vmul.f32 0.70710677, %v1420_v12  ;;  %v1373_v19 = vadd.f32 %v1372_v32, %v1159_v0  ;;  %v1424_v9 = vadd.f32 %v1423_v33, %v1167_v1 }
 0x6ea   : > { %2387 = verf.f32 %v1447_v15  ;;  %v1451_v11 = vmul.f32 0.70710677, %v1371_v43  ;;  %v1453_v27 = vmul.f32 0.70710677, %v1422_v18  ;;  %v1434_v52 = vmul.f32 0.5, %v1367_v5 }
 0x6eb   : > { %2389 = verf.f32 %v1449_v16  ;;  %v1452_v22 = vmul.f32 0.70710677, %v1373_v19  ;;  %v1454_v24 = vmul.f32 0.70710677, %v1424_v9  ;;  %v1436_v53 = vmul.f32 0.5, %v1418_v6 }
 0x6ec   : > { %2391 = verf.f32 %v1448_v40  ;;  %v1435_v56 = vmul.f32 0.5, %v1369_v10  ;;  %v1438_v57 = vmul.f32 0.5, %v1371_v43  ;;  %v1437_v60 = vmul.f32 0.5, %v1420_v12 }
 0x6ed   : > { %2393 = verf.f32 %v1450_v17  ;;  %v1376_v23 = vpop.f32.mrb[24].mxu0  ;;  %v1427_v26 = vpop.f32.mrb[16].mxu1  ;;  %v1439_v4 = vmul.f32 0.5, %v1373_v19  ;;  %v1441_v6 = vmul.f32 0.5, %v1424_v9 }
 0x6ee   : > { %2395 = verf.f32 %v1451_v11  ;;  %v2908_v25 = vadd.f32 %v1376_v23, %v1155_v62  ;;  %v1378_v28 = vpop.f32.mrb[25].mxu0  ;;  %v2910_v31 = vadd.f32 %v1427_v26, %v1163_v63  ;;  %v1429_v35 = vpop.f32.mrb[17].mxu1  ;;  %v1440_v62 = vmul.f32 0.5, %v1422_v18 }
 0x6ef   : > { %2397 = verf.f32 %v1453_v27  ;;  %v1379_v34 = vadd.f32 %v1378_v28, %v1159_v0  ;;  %v1380_v2 = vpop.f32.mrb[26].mxu0  ;;  %v1430_v37 = vadd.f32 %v1429_v35, %v1167_v1  ;;  %v1431_v38 = vpop.f32.mrb[18].mxu1 }
 0x6f0   : > { %2399 = verf.f32 %v1452_v22  ;;  %v1455_v36 = vmul.f32 0.70710677, %v2908_v25  ;;  %v1381_v39 = vpop.f32.mrb[27].mxu0  ;;  %v1457_v41 = vmul.f32 0.70710677, %v2910_v31  ;;  %v1432_v42 = vpop.f32.mrb[19].mxu1 }
 0x6f1   : > { %2401 = verf.f32 %v1454_v24  ;;  %v1456_v44 = vmul.f32 0.70710677, %v1379_v34  ;;  %v1458_v45 = vmul.f32 0.70710677, %v1430_v37  ;;  %v1443_v33 = vmul.f32 0.5, %v1379_v34 }
 0x6f2   : > { %2403 = verf.f32 %v1455_v36  ;;  %v1445_v19 = vmul.f32 0.5, %v1430_v37  ;;  %v1442_v28 = vmul.f32 0.5, %v2908_v25  ;;  %v1444_v2 = vmul.f32 0.5, %v2910_v31  ;;  %v2052_v25 = vld [vmem:[%s2946_s10] ss:$0 sm:$0xff] }
 0x6f3   : > { %2405 = verf.f32 %v1457_v41 }
 0x6f4   : > { %v2388_v46 = vpop.eup %2387  ;;  %2407 = verf.f32 %v1456_v44 }
 0x6f5   : > { %v2390_v47 = vpop.eup %2389  ;;  %2409 = verf.f32 %v1458_v45  ;;  %v1471_v50 = vadd.f32 1.0, %v2388_v46 }
 0x6f6   : > { %v2392_v48 = vpop.eup %2391  ;;  %v1473_v54 = vadd.f32 1.0, %v2390_v47 }
 0x6f7   : > { %v2394_v49 = vpop.eup %2393  ;;  %v1472_v30 = vadd.f32 1.0, %v2392_v48  ;;  %v1483_v1 = vmul.f32 %v1471_v50, %v1434_v52 }
 0x6f8   : > { %v2396_v51 = vpop.eup %2395  ;;  %v1474_v61 = vadd.f32 1.0, %v2394_v49  ;;  %v1485_v13 = vmul.f32 %v1473_v54, %v1436_v53 }
 0x6f9   : > { %v2398_v55 = vpop.eup %2397  ;;  %v1475_v58 = vadd.f32 1.0, %v2396_v51  ;;  %v1484_v10 = vmul.f32 %v1472_v30, %v1435_v56 }
 0x6fa   : > { %v2400_v59 = vpop.eup %2399  ;;  %v1477_v63 = vadd.f32 1.0, %v2398_v55  ;;  %v1486_v43 = vmul.f32 %v1474_v61, %v1437_v60 }
 0x6fb   : > { %v2402_v0 = vpop.eup %2401  ;;  %v1487_v3 = vmul.f32 %v1475_v58, %v1438_v57  ;;  %v1476_v7 = vadd.f32 1.0, %v2400_v59 }
 0x6fc   : > { %v2404_v8 = vpop.eup %2403  ;;  %v1489_v5 = vmul.f32 %v1477_v63, %v1440_v62  ;;  %v1478_v14 = vadd.f32 1.0, %v2402_v0 }
 0x6fd   : > { %v2406_v15 = vpop.eup %2405  ;;  %v1495_v16 = vpack.c.bf16 %v1487_v3, %v1483_v1  ;;  %v1488_v40 = vmul.f32 %v1476_v7, %v1439_v4  ;;  %v1479_v22 = vadd.f32 1.0, %v2404_v8 }
 0x6fe   : > { %v2408_v17 = vpop.eup %2407  ;;  %v1497_v12 = vpack.c.bf16 %v1489_v5, %v1485_v13  ;;  %v1490_v32 = vmul.f32 %v1478_v14, %v1441_v6  ;;  %v1481_v26 = vadd.f32 1.0, %v2406_v15 }
 0x6ff   : > { %v2410_v18 = vpop.eup %2409  ;;  %v1480_v11 = vadd.f32 1.0, %v2408_v17  ;;  %v1496_v27 = vpack.c.bf16 %v1488_v40, %v1484_v10  ;;  %v1491_v34 = vmul.f32 %v1479_v22, %v1442_v28 }
 0x700   : > { %v1482_v23 = vadd.f32 1.0, %v2410_v18  ;;  %v1498_v24 = vpack.c.bf16 %v1490_v32, %v1486_v43  ;;  %v1493_v39 = vmul.f32 %v1481_v26, %v1444_v2  ;;  %v2086_v2 = vld [vmem:[%s2948_s12] ss:$0 sm:$0xff] }
 0x701   : > { %1798 = vmatprep.mubr.bf16.mxu0 %v1496_v27  ;;  %v1492_v9 = vmul.f32 %v1480_v11, %v1443_v33  ;;  %v1499_v37 = vpack.c.bf16 %v1491_v34, %v1491_v34 }
 0x702   : > { %1846 = vmatprep.mubr.bf16.mxu1 %v1498_v24  ;;  %1799 = vmatmul.mubr.bf16.vlgmr.msra.gmra.mrb[28].mxu0 %v1495_v16  ;;  %v1494_v35 = vmul.f32 %v1482_v23, %v1445_v19  ;;  %v1501_v41 = vpack.c.bf16 %v1493_v39, %v1493_v39 }
 0x703   : > { %1847 = vmatmul.mubr.bf16.vlgmr.msra.gmra.mrb[20].mxu1 %v1497_v12  ;;  %v1500_v36 = vpack.c.bf16 %v1492_v9, %v1492_v9  ;;  %v2085_v9 = vld [vmem:[%s2947_s11] ss:$0 sm:$0xff] }
 0x704   : > { %v1502_v38 = vpack.c.bf16 %v1494_v35, %v1494_v35 }
 0x705   : > { %1806 = vmatprep.mubr.bf16.mxu0 %v1500_v36 }
 0x706   : > { %1854 = vmatprep.mubr.bf16.mxu1 %v1502_v38 }
 0x70a   : > { %1807 = vmatmul.mubr.bf16.gmra.mrb[32].mxu0 %v1499_v37 }
 0x70b   : > { %1855 = vmatmul.mubr.bf16.gmra.mrb[24].mxu1 %v1501_v41 }
 0x7d5   : > { %v2133_v42 = vpop.f32.mrb[28].mxu0 }
 0x7d6   : > { %v2161_v44 = vpop.f32.mrb[20].mxu1  ;;  %v2134_v45 = vpop.f32.mrb[29].mxu0 }
 0x7d7   : > { %v2135_v46 = vadd.f32 %v2134_v45, %v2133_v42  ;;  %v2162_v31 = vpop.f32.mrb[21].mxu1  ;;  %v2136_v47 = vpop.f32.mrb[30].mxu0 }
 0x7d8   : > { %v2163_v48 = vadd.f32 %v2162_v31, %v2161_v44  ;;  %v2164_v49 = vpop.f32.mrb[22].mxu1  ;;  %v2137_v50 = vpop.f32.mrb[31].mxu0 }
 0x7d9   : > { %v1801_v51 = vadd.f32 %v2135_v46, %v2052_v25  ;;  %v2138_v52 = vadd.f32 %v2137_v50, %v2136_v47  ;;  %v2165_v53 = vpop.f32.mrb[23].mxu1 }
 0x7da   : > { %v2166_v54 = vadd.f32 %v2165_v53, %v2164_v49 }
 0x7db   : > { %v1849_v55 = vadd.f32 %v2163_v48, %v1801_v51  ;;  %v1804_v56 = vadd.f32 %v2138_v52, %v2052_v25 }
 0x7dd   : > { %v1852_v30 = vadd.f32 %v2166_v54, %v1804_v56  ;;  %v2139_v57 = vpop.f32.mrb[32].mxu0  ;;  %v1862_v58 = vadd.f32 %v1849_v55, %v2796_v20 }
 0x7de   : > { %v2167_v59 = vpop.f32.mrb[24].mxu1  ;;  %v2140_v60 = vpop.f32.mrb[33].mxu0 }
 0x7df   : > { %v2141_v61 = vadd.f32 %v2140_v60, %v2139_v57  ;;  %v2168_v62 = vpop.f32.mrb[25].mxu1  ;;  %v2142_v63 = vpop.f32.mrb[34].mxu0  ;;  %1867 = vadd.xlane.f32.xlu0 %v1862_v58  ;;  %v1863_v0 = vadd.f32 %v1852_v30, %v2798_v21 }
 0x7e0   : > { %v2169_v1 = vadd.f32 %v2168_v62, %v2167_v59  ;;  %v2170_v3 = vpop.f32.mrb[26].mxu1  ;;  %v2143_v4 = vpop.f32.mrb[35].mxu0 }
 0x7e1   : > { %v1809_v7 = vadd.f32 %v2141_v61, %v2052_v25  ;;  %v2171_v8 = vpop.f32.mrb[27].mxu1  ;;  %1869 = vadd.xlane.f32.xlu1 %v1863_v0 }
 0x7e3   : > { %v1857_v13 = vadd.f32 %v2169_v1, %v1809_v7 }
 0x7e5   : > { %v1864_v5 = vadd.f32 %v1857_v13, %v2816_v29 }
 0x7e7   : > { %1871 = vadd.xlane.f32.xlu0 %v1864_v5 }
 0x86c   : > { %v1868_v6 = vpop.xlane.xlu0 %1867 }
 0x86d   : > { %v1873_v20 = vmul.f32 0.0078125, %v1868_v6 }
 0x86e   : > { %v1870_v14 = vpop.xlane.xlu1 %1869 }
 0x86f   : > { %v1876_v15 = vsub.f32 %v1862_v58, %v1873_v20  ;;  %v1874_v10 = vmul.f32 0.0078125, %v1870_v14 }
 0x871   : > { %v1877_v16 = vsub.f32 %v1863_v0, %v1874_v10  ;;  %v1879_v40 = vmul.f32 %v1876_v15, %v1876_v15 }
 0x873   : > { %1882 = vadd.xlane.f32.xlu1 %v1879_v40  ;;  %v1880_v17 = vmul.f32 %v1877_v16, %v1877_v16 }
 0x874   : > { %v1872_v21 = vpop.xlane.xlu0 %1871 }
 0x875   : > { %v1875_v43 = vmul.f32 0.0078125, %v1872_v21  ;;  %1884 = vadd.xlane.f32.xlu0 %v1880_v17 }
 0x877   : > { %v1878_v12 = vsub.f32 %v1864_v5, %v1875_v43 }
 0x879   : > { %v1881_v32 = vmul.f32 %v1878_v12, %v1878_v12 }
 0x87b   : > { %1886 = vadd.xlane.f32.xlu1 %v1881_v32 }
 0x900   : > { %v1883_v18 = vpop.xlane.xlu1 %1882 }
 0x901   : > { %v1888_v33 = vmul.f32 0.0078125, %v1883_v18 }
 0x902   : > { %v1885_v11 = vpop.xlane.xlu0 %1884 }
 0x903   : > { %v1891_v29 = vadd.f32 1e-12, %v1888_v33  ;;  %v1889_v27 = vmul.f32 0.0078125, %v1885_v11 }
 0x905   : > { %2411 = vrsqrt.f32 %v1891_v29  ;;  %v1892_v22 = vadd.f32 1e-12, %v1889_v27 }
 0x907   : > { %2413 = vrsqrt.f32 %v1892_v22 }
 0x908   : > { %v1887_v19 = vpop.xlane.xlu1 %1886 }
 0x909   : > { %v1890_v23 = vmul.f32 0.0078125, %v1887_v19 }
 0x90b   : > { %v1893_v24 = vadd.f32 1e-12, %v1890_v23 }
 0x90d   : > { %2415 = vrsqrt.f32 %v1893_v24 }
 0x90f   : > { %v2412_v26 = vpop.eup %2411 }
 0x910   : > { %v1897_v28 = vmul.f32 %v2412_v26, %v1876_v15 }
 0x911   : > { %v2414_v35 = vpop.eup %2413 }
 0x912   : > { %v1906_v36 = vmul.f32 %v2085_v9, %v1897_v28  ;;  %v1898_v38 = vmul.f32 %v2414_v35, %v1877_v16 }
 0x914   : > { %v1915_v34 = vadd.f32 %v2086_v2, %v1906_v36  ;;  %v1907_v39 = vmul.f32 %v2085_v9, %v1898_v38 }
 0x916   : > { %1918 = vst [vmem:[%s440_s15] sm:$0xff] %v1915_v34  ;;  %v1916_v37 = vadd.f32 %v2086_v2, %v1907_v39 }
 0x917   : > { %v2416_v41 = vpop.eup %2415 }
 0x918   : > { %1919 = vst [vmem:[%s440_s15 + $0x8] sm:$0xff] %v1916_v37  ;;  %v1899_v42 = vmul.f32 %v2416_v41, %v1878_v12 }
 0x91a   : > { %v1908_v44 = vmul.f32 %v2085_v9, %v1899_v42 }
 0x91c   : > { %v1917_v25 = vadd.f32 %v2086_v2, %v1908_v44 }
 0x91e   : > { %1920 = vst [vmem:[%s440_s15 + $0x10] sm:$0xff] %v1917_v25 }
 0x91f PF: > { %s23_s25 = sadd.s32 1, %s2423_s25  }
 0x920   : > { %p20_p4 = scmp.ge.s32.totalorder %s23_s25, 4  }
 0x922   :  { %22 = sbr.rel (!%p20_p4) target bundleno = 1 (0x1), region = 102 }

</bundles_post_ra>
